<compile_context>
chip_gen: v7x
topology: tpu7x:2x2x1
jax: 0.10.0
libtpu: 0.0.40
codegen_flags: <defaults>
</compile_context>

<pallas_src>
import functools

import jax
import jax.numpy as jnp
from jax.experimental import pallas as pl
from jax.experimental.pallas import tpu as pltpu


def _round_up(x, m):
    return ((x + m - 1) // m) * m


def _mlp_dropout_kernel(x_ref, w1_ref, b1_ref, w2_ref, b2_ref, u_ref, o_ref,
                        *, p, training):
    # fc1 + ReLU  (bf16 operands, f32 accumulate on the MXU)
    h = jnp.dot(x_ref[...], w1_ref[...], preferred_element_type=jnp.float32)
    h = jnp.maximum(h + b1_ref[...], 0.0)          # b1 is (1, Hp) -> broadcasts

    # fc2
    out = jnp.dot(h.astype(w2_ref.dtype), w2_ref[...],
                  preferred_element_type=jnp.float32)
    out = out + b2_ref[...]                        # b2 is (1, Np)

    if training and p > 0.0:
        # Dropout: keep with prob (1 - p), scale survivors by 1/(1 - p).
        keep = u_ref[...] >= jnp.float32(p)
        out = jnp.where(keep, out * (1.0 / (1.0 - p)), 0.0)

    o_ref[...] = out.astype(o_ref.dtype)


def neural_net_forward(x, w1, b1, w2, b2, key, *, p=0.5, training=True):
    """x: (B, input_size) f32; w1: (input_size, hidden); w2: (hidden, classes);
    b1: (hidden,); b2: (classes,). Returns (B, classes) f32."""
    B, K = x.shape
    H = w1.shape[1]
    N = w2.shape[1]

    # Lane-dense padding of every feature dim to a multiple of 128.
    Kp = _round_up(K, 128)
    Hp = _round_up(H, 128)
    Np = _round_up(N, 128)

    # Batch tile: big enough to amortize MXU fill/drain and per-step overhead,
    # but never larger than the (sublane-rounded) batch itself.
    TM = min(256, _round_up(B, 8))
    Bp = _round_up(B, TM)

    # Zero-padded, bf16 operands (zeros in padded rows/cols keep the math exact).
    xp = jnp.zeros((Bp, Kp), jnp.bfloat16).at[:B, :K].set(x.astype(jnp.bfloat16))
    w1p = jnp.zeros((Kp, Hp), jnp.bfloat16).at[:K, :H].set(w1.astype(jnp.bfloat16))
    b1p = jnp.zeros((1, Hp), jnp.float32).at[0, :H].set(b1.astype(jnp.float32))
    w2p = jnp.zeros((Hp, Np), jnp.bfloat16).at[:H, :N].set(w2.astype(jnp.bfloat16))
    b2p = jnp.zeros((1, Np), jnp.float32).at[0, :N].set(b2.astype(jnp.float32))

    # Host-generated uniform randoms for dropout (deterministic, per-element).
    if training and p > 0.0:
        u = jax.random.uniform(key, (Bp, Np), jnp.float32)
    else:
        u = jnp.ones((Bp, Np), jnp.float32)

    grid = (Bp // TM,)
    kernel = functools.partial(_mlp_dropout_kernel, p=p, training=training)

    out_padded = pl.pallas_call(
        kernel,
        out_shape=jax.ShapeDtypeStruct((Bp, Np), jnp.float32),
        grid=grid,
        in_specs=[
            pl.BlockSpec((TM, Kp), lambda i: (i, 0)),   # x tile (pipelined)
            pl.BlockSpec((Kp, Hp), lambda i: (0, 0)),   # w1 (resident)
            pl.BlockSpec((1, Hp), lambda i: (0, 0)),    # b1 (resident)
            pl.BlockSpec((Hp, Np), lambda i: (0, 0)),   # w2 (resident)
            pl.BlockSpec((1, Np), lambda i: (0, 0)),    # b2 (resident)
            pl.BlockSpec((TM, Np), lambda i: (i, 0)),   # dropout uniforms tile
        ],
        out_specs=pl.BlockSpec((TM, Np), lambda i: (i, 0)),
        compiler_params=pltpu.CompilerParams(
            dimension_semantics=("parallel",)),
    )(xp, w1p, b1p, w2p, b2p, u)

    return out_padded[:B, :N]


def init_params(key, input_size, hidden_size, num_classes):
    """Deterministic init mimicking torch.nn.Linear default (U(-1/sqrt(fan_in), +))."""
    k1, k2, k3, k4 = jax.random.split(key, 4)
    bound1 = 1.0 / jnp.sqrt(input_size)
    bound2 = 1.0 / jnp.sqrt(hidden_size)
    # Weights stored pre-transposed: (in_features, out_features) -> kernel does x @ W + b.
    w1 = jax.random.uniform(k1, (input_size, hidden_size), jnp.float32,
                            -bound1, bound1)
    b1 = jax.random.uniform(k2, (hidden_size,), jnp.float32, -bound1, bound1)
    w2 = jax.random.uniform(k3, (hidden_size, num_classes), jnp.float32,
                            -bound2, bound2)
    b2 = jax.random.uniform(k4, (num_classes,), jnp.float32, -bound2, bound2)
    return w1, b1, w2, b2


if __name__ == "__main__":
    input_size, hidden_size, num_classes = 32, 64, 16
    batch = 8

    key = jax.random.PRNGKey(0)
    kx, kp, kd = jax.random.split(key, 3)
    x = jax.random.normal(kx, (batch, input_size), jnp.float32)
    w1, b1, w2, b2 = init_params(kp, input_size, hidden_size, num_classes)

    out = neural_net_forward(x, w1, b1, w2, b2, kd, p=0.5, training=True)
    out = jax.block_until_ready(out)
    assert out.shape == (batch, num_classes)
    assert out.dtype == jnp.float32
    assert bool(jnp.all(jnp.isfinite(out)))

    # Eval mode (dropout = identity) also runs.
    out_eval = jax.block_until_ready(
        neural_net_forward(x, w1, b1, w2, b2, kd, p=0.5, training=False))
    assert out_eval.shape == (batch, num_classes)

    print("KERNEL_OK")
</pallas_src>

<mosaic_0001>
module attributes {stable_mosaic.version = 11 : i64} {
  func.func @_mlp_dropout_kernel(%arg0: i32, %arg1: memref<8x128xbf16, #tpu.memory_space<vmem>>, %arg2: memref<128x128xbf16, #tpu.memory_space<vmem>>, %arg3: memref<1x128xf32, #tpu.memory_space<vmem>>, %arg4: memref<128x128xbf16, #tpu.memory_space<vmem>>, %arg5: memref<1x128xf32, #tpu.memory_space<vmem>>, %arg6: memref<8x128xf32, #tpu.memory_space<vmem>>, %arg7: memref<8x128xf32, #tpu.memory_space<vmem>>) attributes {dimension_semantics = [#tpu.dimension_semantics<parallel>], iteration_bounds = array<i64: 1>, scalar_prefetch = 0 : i64, scratch_operands = 0 : i64, tpu.core_type = #tpu.core_type<tc>, window_params = [{transform_indices = @transform_0, window_bounds = array<i64: 8, 128>}, {pipeline_mode = #tpu.pipeline_mode<synchronous>, transform_indices = @transform_1, window_bounds = array<i64: 128, 128>}, {pipeline_mode = #tpu.pipeline_mode<synchronous>, transform_indices = @transform_2, window_bounds = array<i64: 1, 128>}, {pipeline_mode = #tpu.pipeline_mode<synchronous>, transform_indices = @transform_3, window_bounds = array<i64: 128, 128>}, {pipeline_mode = #tpu.pipeline_mode<synchronous>, transform_indices = @transform_4, window_bounds = array<i64: 1, 128>}, {transform_indices = @transform_5, window_bounds = array<i64: 8, 128>}, {transform_indices = @transform_6, window_bounds = array<i64: 8, 128>}]} {
    %c0 = arith.constant 0 : index
    %c0_0 = arith.constant 0 : index
    %0 = vector.load %arg1[%c0, %c0_0] : memref<8x128xbf16, #tpu.memory_space<vmem>>, vector<8x128xbf16>
    %c0_1 = arith.constant 0 : index
    %c0_2 = arith.constant 0 : index
    %1 = vector.load %arg2[%c0_1, %c0_2] : memref<128x128xbf16, #tpu.memory_space<vmem>>, vector<128x128xbf16>
    %cst = arith.constant dense<0.000000e+00> : vector<8x128xf32>
    %2 = tpu.matmul %0, %1, %cst {dimension_numbers = #tpu.dot_dimension_numbers<[1], [0], [0], [1], [0, 0, 1, 1], [], []>} : vector<8x128xbf16>, vector<128x128xbf16>, vector<8x128xf32> -> vector<8x128xf32>
    %c0_3 = arith.constant 0 : index
    %c0_4 = arith.constant 0 : index
    %3 = vector.load %arg3[%c0_3, %c0_4] : memref<1x128xf32, #tpu.memory_space<vmem>>, vector<1x128xf32>
    %4 = vector.broadcast %3 : vector<1x128xf32> to vector<8x128xf32>
    %5 = arith.addf %2, %4 : vector<8x128xf32>
    %cst_5 = arith.constant 0.000000e+00 : f32
    %6 = vector.broadcast %cst_5 : f32 to vector<8x128xf32>
    %7 = arith.maximumf %5, %6 : vector<8x128xf32>
    %8 = arith.truncf %7 : vector<8x128xf32> to vector<8x128xbf16>
    %c0_6 = arith.constant 0 : index
    %c0_7 = arith.constant 0 : index
    %9 = vector.load %arg4[%c0_6, %c0_7] : memref<128x128xbf16, #tpu.memory_space<vmem>>, vector<128x128xbf16>
    %cst_8 = arith.constant dense<0.000000e+00> : vector<8x128xf32>
    %10 = tpu.matmul %8, %9, %cst_8 {dimension_numbers = #tpu.dot_dimension_numbers<[1], [0], [0], [1], [0, 0, 1, 1], [], []>} : vector<8x128xbf16>, vector<128x128xbf16>, vector<8x128xf32> -> vector<8x128xf32>
    %c0_9 = arith.constant 0 : index
    %c0_10 = arith.constant 0 : index
    %11 = vector.load %arg5[%c0_9, %c0_10] : memref<1x128xf32, #tpu.memory_space<vmem>>, vector<1x128xf32>
    %12 = vector.broadcast %11 : vector<1x128xf32> to vector<8x128xf32>
    %13 = arith.addf %10, %12 : vector<8x128xf32>
    %c0_11 = arith.constant 0 : index
    %c0_12 = arith.constant 0 : index
    %14 = vector.load %arg6[%c0_11, %c0_12] : memref<8x128xf32, #tpu.memory_space<vmem>>, vector<8x128xf32>
    %cst_13 = arith.constant 5.000000e-01 : f32
    %15 = vector.broadcast %cst_13 : f32 to vector<8x128xf32>
    %16 = arith.cmpf oge, %14, %15 : vector<8x128xf32>
    %cst_14 = arith.constant 2.000000e+00 : f32
    %17 = vector.broadcast %cst_14 : f32 to vector<8x128xf32>
    %18 = arith.mulf %13, %17 : vector<8x128xf32>
    %cst_15 = arith.constant 0.000000e+00 : f32
    %19 = vector.broadcast %cst_15 : f32 to vector<8x128xf32>
    %20 = arith.select %16, %18, %19 : vector<8x128xi1>, vector<8x128xf32>
    %c0_16 = arith.constant 0 : index
    %c0_17 = arith.constant 0 : index
    %21 = vector.load %arg7[%c0_16, %c0_17] : memref<8x128xf32, #tpu.memory_space<vmem>>, vector<8x128xf32>
    tpu.vector_store %arg7[%c0_16, %c0_17], %20 {strides = array<i32>} : memref<8x128xf32, #tpu.memory_space<vmem>>, vector<8x128xf32>,
    return
  }
  func.func @transform_0(%arg0: i32) -> (i32, i32) {
    %c0_i32 = arith.constant 0 : i32
    %c0_i32_0 = arith.constant 0 : i32
    return %arg0, %c0_i32 : i32, i32
  }
  func.func @transform_1(%arg0: i32) -> (i32, i32) {
    %c0_i32 = arith.constant 0 : i32
    %c0_i32_0 = arith.constant 0 : i32
    %c0_i32_1 = arith.constant 0 : i32
    return %c0_i32, %c0_i32_0 : i32, i32
  }
  func.func @transform_2(%arg0: i32) -> (i32, i32) {
    %c0_i32 = arith.constant 0 : i32
    %c0_i32_0 = arith.constant 0 : i32
    %c0_i32_1 = arith.constant 0 : i32
    return %c0_i32, %c0_i32_0 : i32, i32
  }
  func.func @transform_3(%arg0: i32) -> (i32, i32) {
    %c0_i32 = arith.constant 0 : i32
    %c0_i32_0 = arith.constant 0 : i32
    %c0_i32_1 = arith.constant 0 : i32
    return %c0_i32, %c0_i32_0 : i32, i32
  }
  func.func @transform_4(%arg0: i32) -> (i32, i32) {
    %c0_i32 = arith.constant 0 : i32
    %c0_i32_0 = arith.constant 0 : i32
    %c0_i32_1 = arith.constant 0 : i32
    return %c0_i32, %c0_i32_0 : i32, i32
  }
  func.func @transform_5(%arg0: i32) -> (i32, i32) {
    %c0_i32 = arith.constant 0 : i32
    %c0_i32_0 = arith.constant 0 : i32
    return %arg0, %c0_i32 : i32, i32
  }
  func.func @transform_6(%arg0: i32) -> (i32, i32) {
    %c0_i32 = arith.constant 0 : i32
    %c0_i32_0 = arith.constant 0 : i32
    return %arg0, %c0_i32 : i32, i32
  }
}

</mosaic_0001>

<bundles_post_ra>
// kernel: tpu_custom_call.1
= control target key start
LH: loop header
LB: loop body
LE: loop exit
PB: predicated region body
PF: predicated region fallthrough
CT: control target
= control target key end

     0   :  { %11 = vsyncpa [#allocation3], 0  ;;  %s610_s0 = inlined_call_operand.hbm [shape: bf16[8,128], index: 0, kind: input, shape index: {}]   ;;  %s611_s1 = inlined_call_operand.hbm [shape: bf16[128,128], index: 1, kind: input, shape index: {}]   ;;  %s612_s2 = inlined_call_operand.vmem [shape: f32[1,128], index: 2, kind: input, shape index: {}]   ;;  %s613_s3 = inlined_call_operand.hbm [shape: bf16[128,128], index: 3, kind: input, shape index: {}]   ;;  %s614_s4 = inlined_call_operand.vmem [shape: f32[1,128], index: 4, kind: input, shape index: {}]   ;;  %s615_s5 = inlined_call_operand.vmem [shape: f32[8,128], index: 5, kind: input, shape index: {}]   ;;  %s616_s6 = inlined_call_operand.hbm [shape: f32[8,128], index: 6, kind: output, shape index: {}]  }
   0x1   :  { %12 = vsyncpa [#allocation6], 0 }
   0x2   :  { %13 = vsyncpa [#allocation4], 0  ;;  %s504_s21 = smov [#allocation5]   ;;  %s410_s25 = scalar_lea.hbm %s611_s1, 1024 }
   0x3   :  { %s29_s22 = sshll.u32 %s504_s21, 4  ;;  %p411_p0 = scmp.ne.s32.totalorder %s611_s1, %s410_s25  ;;  %s30_s22 = int_to_ptr.vmem [resolvable:$true] %s29_s22 }
   0x4   :  { %p414_p1 = scmp.lt.u32.totalorder %s410_s25, %s611_s1 }
   0x6   :  { %p416_p2 = pnand %p414_p1, %p411_p0 }
   0x8   :  { %419 = shalt.err (!%p416_p2)
}
   0x9   :  { %s420_s30 = scalar_lea.vmem %s30_s22, 1024  ;;  %p425_p4 = scmp.lt.s32.totalorder %s30_s22, %s30_s22 }
   0xa   :  { %p421_p3 = scmp.ne.s32.totalorder %s30_s22, %s420_s30  ;;  %p426_p5 = scmp.lt.s32.totalorder %s420_s30, %s420_s30 }
   0xc   :  { %p427_p6 = por %p426_p5, %p425_p4 }
   0xe   :  { %p428_p7 = pnand %p427_p6, %p421_p3 }
  0x10   :  { %431 = shalt.err (!%p428_p7)
}
  0x11   :  { %s505_s7 = smov 64   ;;  %s506_s8 = smov 4  }
  0x12   :  { %35 = dma.hbm_to_vmem [thread:$0]  %s611_s1, 1024, %s30_s22, [#allocation6], %s505_s7, %s505_s7, %s506_s8  }
  0x13   :  { %s507_s11 = smov [#allocation2]   ;;  %s508_s13 = smov [#allocation7]  }
  0x14   :  { %s20_s12 = sshll.u32 %s507_s11, 4  ;;  %s43_s14 = sshll.u32 %s508_s13, 4  ;;  %s21_s12 = int_to_ptr.vmem [resolvable:$true] %s20_s12  ;;  %s44_s14 = int_to_ptr.vmem [resolvable:$true] %s43_s14 }
  0x15   :  { %s432_s17 = scalar_lea.hbm %s610_s0, 64 }
  0x16   :  { %p433_p8 = scmp.ne.s32.totalorder %s610_s0, %s432_s17  ;;  %p436_p9 = scmp.lt.u32.totalorder %s432_s17, %s610_s0 }
  0x18   :  { %p438_p10 = pnand %p436_p9, %p433_p8 }
  0x1a   :  { %441 = shalt.err (!%p438_p10)
}
  0x1b   :  { %s442_s1 = scalar_lea.vmem %s21_s12, 64  ;;  %p447_p12 = scmp.lt.s32.totalorder %s21_s12, %s21_s12 }
  0x1c   :  { %p443_p11 = scmp.ne.s32.totalorder %s21_s12, %s442_s1  ;;  %p448_p13 = scmp.lt.s32.totalorder %s442_s1, %s442_s1 }
  0x1e   :  { %p449_p0 = por %p448_p13, %p447_p12 }
  0x20   :  { %p450_p1 = pnand %p449_p0, %p443_p11 }
  0x22   :  { %453 = shalt.err (!%p450_p1)
}
  0x23   :  { %23 = dma.hbm_to_vmem [thread:$0]  %s610_s0, 64, %s21_s12, [#allocation3]  }
  0x24   :  { %s454_s26 = scalar_lea.hbm %s613_s3, 1024 }
  0x25   :  { %p455_p2 = scmp.ne.s32.totalorder %s613_s3, %s454_s26  ;;  %p458_p3 = scmp.lt.u32.totalorder %s454_s26, %s613_s3 }
  0x27   :  { %p460_p4 = pnand %p458_p3, %p455_p2 }
  0x29   :  { %463 = shalt.err (!%p460_p4)
}
  0x2a   :  { %s464_s9 = scalar_lea.vmem %s44_s14, 1024  ;;  %p469_p6 = scmp.lt.s32.totalorder %s44_s14, %s44_s14 }
  0x2b   :  { %p465_p5 = scmp.ne.s32.totalorder %s44_s14, %s464_s9  ;;  %p470_p7 = scmp.lt.s32.totalorder %s464_s9, %s464_s9 }
  0x2d   :  { %p471_p8 = por %p470_p7, %p469_p6 }
  0x2f   :  { %p472_p9 = pnand %p471_p8, %p465_p5 }
  0x31   :  { %475 = shalt.err (!%p472_p9)
}
  0x32   :  { %49 = dma.hbm_to_vmem [thread:$0]  %s613_s3, 1024, %s44_s14, [#allocation6], %s505_s7, %s505_s7, %s506_s8  }
  0x33   :  { %498 = dma.done.wait [#allocation3], 64  }
  0x34   :  { %499 = vsyncadd [#allocation3], 4294967232 }
  0x35   :  { %500 = dma.done.wait [#allocation6], 2048  }
  0x36   :  { %501 = vsyncadd [#allocation6], 4294965248  ;;  %v509_v0 = vmov 0.0   ;;  %vm510_vm0 = vmmov 0   ;;  %v394_v1 = vld [vmem:[#allocation5] sm:$0xff]   ;;  %v395_v2 = vld [vmem:[#allocation5 + $0x8] sm:$0xff]  }
  0x37   :  { %346 = vmatprep.subr.bf16.mxu0 %v509_v0  ;;  %362 = vmatprep.mubr.msk.bf16.mxu0 %vm510_vm0, %v509_v0  ;;  %v396_v3 = vld [vmem:[#allocation5 + $0x10] sm:$0xff]   ;;  %v402_v4 = vld [vmem:[#allocation7] sm:$0xff]   ;;  %v397_v5 = vld [vmem:[#allocation5 + $0x18] sm:$0xff]  }
  0x38   :  { %366 = vmatprep.subr.bf16.mxu1 %v509_v0  ;;  %382 = vmatprep.mubr.msk.bf16.mxu1 %vm510_vm0, %v509_v0  ;;  %v403_v6 = vld [vmem:[#allocation7 + $0x8] sm:$0xff]   ;;  %v398_v7 = vld [vmem:[#allocation5 + $0x20] sm:$0xff]   ;;  %v404_v8 = vld [vmem:[#allocation7 + $0x10] sm:$0xff]  }
  0x39   :  { %347 = vmatpush3.bf16.msra.mxu0 %v394_v1  ;;  %367 = vmatpush3.bf16.msra.mxu1 %v402_v4  ;;  %v399_v9 = vld [vmem:[#allocation5 + $0x28] sm:$0xff]   ;;  %v405_v10 = vld [vmem:[#allocation7 + $0x18] sm:$0xff]   ;;  %v400_v11 = vld [vmem:[#allocation5 + $0x30] sm:$0xff]  }
  0x3a   :  { %348 = vmatprep.subr.bf16.mxu0 %v509_v0  ;;  %368 = vmatprep.subr.bf16.mxu1 %v509_v0  ;;  %v406_v12 = vld [vmem:[#allocation7 + $0x20] sm:$0xff]   ;;  %v401_v13 = vld [vmem:[#allocation5 + $0x38] sm:$0xff]   ;;  %v407_v14 = vld [vmem:[#allocation7 + $0x28] sm:$0xff]  }
  0x3b   :  { %v64_v15 = vld [vmem:[#allocation2] sm:$0xf]  ;;  %v408_v16 = vld [vmem:[#allocation7 + $0x30] sm:$0xff]  }
  0x3c   :  { %v409_v17 = vld [vmem:[#allocation7 + $0x38] sm:$0xff]   ;;  %v310_v18 = vld [vmem:[%s612_s2] ss:$0 sm:$0xff]  ;;  %s511_s2 = smov [#allocation8]  }
  0x3d   :  { %349 = vmatpush3.bf16.msra.mxu0 %v395_v2  ;;  %369 = vmatpush3.bf16.msra.mxu1 %v403_v6  ;;  %v319_v26 = vld [vmem:[%s614_s4] ss:$0 sm:$0xff]  ;;  %s300_s14 = sshll.u32 %s511_s2, 4  ;;  %s301_s14 = int_to_ptr.vmem [resolvable:$true] %s300_s14 }
  0x3e   :  { %350 = vmatprep.subr.bf16.mxu0 %v509_v0  ;;  %370 = vmatprep.subr.bf16.mxu1 %v509_v0  ;;  %v289_v27 = vld [vmem:[%s615_s5] sm:$0xff]  ;;  %s476_s15 = scalar_lea.vmem %s301_s14, 128  ;;  %p481_p11 = scmp.lt.s32.totalorder %s301_s14, %s301_s14 }
  0x3f   :  { %vm290_vm1 = vcmp.ge.f32.partialorder %v289_v27, 0.5  ;;  %p477_p10 = scmp.ne.s32.totalorder %s301_s14, %s476_s15  ;;  %p482_p12 = scmp.lt.s32.totalorder %s476_s15, %s476_s15 }
  0x41   :  { %351 = vmatpush3.bf16.msra.mxu0 %v396_v3  ;;  %371 = vmatpush3.bf16.msra.mxu1 %v404_v8  ;;  %p483_p13 = por %p482_p12, %p481_p11 }
  0x42   :  { %352 = vmatprep.subr.bf16.mxu0 %v509_v0  ;;  %372 = vmatprep.subr.bf16.mxu1 %v509_v0 }
  0x43   :  { %p484_p0 = pnand %p483_p13, %p477_p10 }
  0x45   :  { %353 = vmatpush3.bf16.msra.mxu0 %v397_v5  ;;  %373 = vmatpush3.bf16.msra.mxu1 %v405_v10 }
  0x46   :  { %354 = vmatprep.subr.bf16.mxu0 %v509_v0  ;;  %374 = vmatprep.subr.bf16.mxu1 %v509_v0 }
  0x49   :  { %355 = vmatpush3.bf16.msra.mxu0 %v398_v7  ;;  %375 = vmatpush3.bf16.msra.mxu1 %v406_v12 }
  0x4a   :  { %356 = vmatprep.subr.bf16.mxu0 %v509_v0  ;;  %376 = vmatprep.subr.bf16.mxu1 %v509_v0 }
  0x4d   :  { %357 = vmatpush3.bf16.msra.mxu0 %v399_v9  ;;  %377 = vmatpush3.bf16.msra.mxu1 %v407_v14 }
  0x4e   :  { %358 = vmatprep.subr.bf16.mxu0 %v509_v0  ;;  %378 = vmatprep.subr.bf16.mxu1 %v509_v0 }
  0x51   :  { %359 = vmatpush3.bf16.msra.mxu0 %v400_v11  ;;  %379 = vmatpush3.bf16.msra.mxu1 %v408_v16 }
  0x52   :  { %360 = vmatprep.subr.bf16.mxu0 %v509_v0  ;;  %380 = vmatprep.subr.bf16.mxu1 %v509_v0 }
  0x55   :  { %361 = vmatpush3.bf16.msra.mxu0 %v401_v13  ;;  %381 = vmatpush3.bf16.msra.mxu1 %v409_v17 }
  0x58   :  { %363 = vmatmul.mubr.bf16.vlgmr.msra.gmra.mrb[0].mxu0 %v64_v15 }
 0x12b   :  { %v170_v19 = vpop.f32.mrb[0].mxu0 }
 0x12c   :  { %v171_v20 = vadd.f32 %v310_v18, %v170_v19  ;;  %v364_v21 = vpop.f32.mrb[1].mxu0 }
 0x12d   :  { %v173_v22 = vpop.f32.mrb[2].mxu0 }
 0x12e   :  { %v176_v23 = vmax.f32 %v171_v20, 0.0  ;;  %v365_v24 = vpop.f32.mrb[3].mxu0 }
 0x130   :  { %v177_v25 = vpack.c.bf16 %v176_v23, %v176_v23 }
 0x132   :  { %383 = vmatmul.mubr.bf16.vlgmr.msra.gmra.mrb[0].mxu1 %v177_v25 }
 0x205   :  { %v283_v28 = vpop.f32.mrb[0].mxu1 }
 0x206   :  { %v284_v29 = vadd.f32 %v319_v26, %v283_v28  ;;  %v384_v30 = vpop.f32.mrb[1].mxu1 }
 0x207   :  { %v286_v31 = vpop.f32.mrb[2].mxu1 }
 0x208   :  { %v291_v32 = vmul.f32 2.0, %v284_v29  ;;  %v385_v33 = vpop.f32.mrb[3].mxu1 }
 0x20a   :  { %v292_v34 = vsel %vm290_vm1, %v291_v32, 0.0 }
 0x20b   :  { %293 = vst [vmem:[#allocation8] sm:$0xff] %v292_v34 }
 0x20c   :  { %487 = shalt.err (!%p484_p0)
}
 0x20d   :  { %s488_s16 = scalar_lea.hbm %s616_s6, 128 }
 0x20e   :  { %p489_p1 = scmp.ne.s32.totalorder %s616_s6, %s488_s16  ;;  %p492_p2 = scmp.lt.u32.totalorder %s488_s16, %s616_s6 }
 0x210   :  { %p494_p3 = pnand %p492_p2, %p489_p1 }
 0x212   :  { %497 = shalt.err (!%p494_p3)
}
 0x213   :  { %303 = dma.vmem_to_hbm [thread:$0]  %s301_s14, 128, %s616_s6, [#allocation4]  }
 0x214   :  { %502 = dma.done.wait [#allocation4], 128  }
 0x215   :  { %503 = vsyncadd [#allocation4], 4294967168 }
 0x216   :  { %307 = vsyncpa [#allocation3], 1 }
 0x217   :  { %308 = vsyncpa [#allocation6], 1 }
 0x218   :  { %309 = vsyncpa [#allocation4], 1 }

</bundles_post_ra>
